<compile_context>
chip_gen: v7x
topology: tpu7x:2x2x1
jax: 0.10.0
libtpu: 0.0.40
codegen_flags: <defaults>
</compile_context>

<pallas_src>
import functools
import math

import jax
import jax.numpy as jnp
from jax import lax
from jax.experimental import pallas as pl
from jax.experimental.pallas import tpu as pltpu


# ----------------------------- per-generation tuning ------------------------------

def _tpu_tuning():
    """Derive VMEM budget and tile caps from the actual chip (v5e/v6e: 128 MiB, v7x: 64 MiB)."""
    try:
        cap = int(pltpu.get_tpu_info().vmem_capacity_bytes)
    except Exception:
        cap = 0
    if cap >= 100 * 1024 * 1024:           # v5e / v6e: 128 MiB physical -> bigger token tiles
        return {"vmem_limit": 96 * 1024 * 1024, "tm": 1024, "tf": 2048, "tq": 256, "tk": 512}
    if cap:                                # v7x: 64 MiB physical
        return {"vmem_limit": min(48 * 1024 * 1024, int(0.75 * cap)),
                "tm": 512, "tf": 1024, "tq": 256, "tk": 512}
    # unknown chip -> conservative
    return {"vmem_limit": 48 * 1024 * 1024, "tm": 512, "tf": 1024, "tq": 256, "tk": 512}


_TUNE = _tpu_tuning()


def _round_up(a, b):
    return (a + b - 1) // b * b


def _token_tile(m, cap):
    # sublane-aligned token tile; ragged tails handled by pl.cdiv grids + masked boundary blocks
    return min(cap, _round_up(m, 8))


def _divisor_tile(n, max_t, align):
    """Largest `align`-aligned divisor of n <= max_t (n itself if already small).
    Falls back to the full dim only when no aligned divisor exists."""
    if n <= max_t:
        return n
    t = (max_t // align) * align
    while t >= align:
        if n % t == 0:
            return t
        t -= align
    return n


def _compiler_params(sem):
    return pltpu.CompilerParams(dimension_semantics=sem,
                                vmem_limit_bytes=_TUNE["vmem_limit"])


# ------------------- fused LayerNorm + per-head projections -----------------------
# One kernel produces Q/K/V (or just Q, or K/V) directly in (B, H, S, dk) layout.
# Grid = (B, S tiles, H); the activation tile is read once (block index constant along H),
# LN is computed once per token tile (at h == 0) into a VMEM scratch and reused for all heads.

def _proj_kernel_body(*refs, n_proj, apply_ln, eps):
    idx = 0
    x_ref = refs[idx]; idx += 1
    if apply_ln:
        g_ref, bln_ref = refs[idx], refs[idx + 1]; idx += 2
    wb = refs[idx: idx + 2 * n_proj]; idx += 2 * n_proj
    outs = refs[idx: idx + n_proj]; idx += n_proj
    xn_ref = refs[idx]

    @pl.when(pl.program_id(2) == 0)
    def _():
        x = x_ref[...].astype(jnp.float32)
        if apply_ln:
            d = x.shape[-1]
            mean = jnp.mean(x, axis=-1, keepdims=True)
            diff = x - mean
            var = jnp.sum(diff * diff, axis=-1, keepdims=True) / (d - 1)  # unbiased, torch.std
            x = (g_ref[...].astype(jnp.float32) * diff / (jnp.sqrt(var) + eps)
                 + bln_ref[...].astype(jnp.float32))
        xn_ref[...] = x.astype(xn_ref.dtype)

    xn = xn_ref[...]
    for p in range(n_proj):
        w_ref, b_ref = wb[2 * p], wb[2 * p + 1]
        y = jnp.dot(xn, w_ref[...], preferred_element_type=jnp.float32)
        outs[p][...] = (y + b_ref[...].astype(jnp.float32)).astype(outs[p].dtype)


def ln_multi_proj(x3d, gamma, beta, weights, biases, *, apply_ln, eps=1e-6):
    """x3d: (B, S, d_model); weights[i]: (H, d_model, dk); biases[i]: (H, 1, dk).
    Returns tuple of (B, H, S, dk) arrays (attention layout, no host transposes)."""
    b, s, d = x3d.shape
    n = len(weights)
    heads, _, dk = weights[0].shape
    ts = _token_tile(s, _TUNE["tm"])
    grid = (b, pl.cdiv(s, ts), heads)

    in_specs = [pl.BlockSpec((None, ts, d), lambda bi, si, hi: (bi, si, 0))]
    args = [x3d]
    if apply_ln:
        in_specs += [pl.BlockSpec((1, d), lambda bi, si, hi: (0, 0))] * 2
        args += [gamma, beta]
    for w, bias in zip(weights, biases):
        in_specs.append(pl.BlockSpec((None, d, dk), lambda bi, si, hi: (hi, 0, 0)))
        in_specs.append(pl.BlockSpec((None, 1, dk), lambda bi, si, hi: (hi, 0, 0)))
        args += [w, bias]

    out_specs = [pl.BlockSpec((None, None, ts, dk), lambda bi, si, hi: (bi, hi, si, 0))
                 for _ in range(n)]
    out_shapes = [jax.ShapeDtypeStruct((b, heads, s, dk), x3d.dtype) for _ in range(n)]

    kernel = functools.partial(_proj_kernel_body, n_proj=n, apply_ln=apply_ln, eps=eps)
    outs = pl.pallas_call(
        kernel,
        out_shape=out_shapes,
        grid_spec=pltpu.PrefetchScalarGridSpec(
            num_scalar_prefetch=0, grid=grid,
            in_specs=in_specs, out_specs=out_specs,
            scratch_shapes=[pltpu.VMEM((ts, d), weights[0].dtype)]),
        compiler_params=_compiler_params(("parallel", "parallel", "arbitrary")),
    )(*args)
    return tuple(outs)


# --------------------------- flash-style attention --------------------------------

def _mha_kernel(q_ref, k_ref, v_ref, m_ref, o_ref, m_sc, l_sc, acc_sc, *, scale):
    ki = pl.program_id(3)

    @pl.when(ki == 0)
    def _():
        m_sc[...] = jnp.full_like(m_sc, -jnp.inf)
        l_sc[...] = jnp.zeros_like(l_sc)
        acc_sc[...] = jnp.zeros_like(acc_sc)

    q = q_ref[...]
    k = k_ref[...]
    s = lax.dot_general(q, k, (((1,), (1,)), ((), ())),
                        preferred_element_type=jnp.float32) * scale
    s = jnp.where(m_ref[...] == 0, -1e9, s)  # masked_fill(mask == 0, -1e9)

    m_prev = m_sc[...]
    m_new = jnp.maximum(m_prev, jnp.max(s, axis=-1, keepdims=True))
    alpha = jnp.exp(m_prev - m_new)
    p = jnp.exp(s - m_new)
    l_sc[...] = alpha * l_sc[...] + jnp.sum(p, axis=-1, keepdims=True)
    acc_sc[...] = alpha * acc_sc[...] + jnp.dot(p.astype(v_ref.dtype), v_ref[...],
                                                preferred_element_type=jnp.float32)
    m_sc[...] = m_new

    @pl.when(ki == pl.num_programs(3) - 1)
    def _():
        inv_l = pl.reciprocal(l_sc[...], approx=True)  # EUP slot, frees the VALU
        # attention dropout (inference mode) == identity
        o_ref[...] = (acc_sc[...] * inv_l).astype(o_ref.dtype)


def mha_attention(q, k, v, mask, *, scale):
    """q/k/v: (B, H, S, dk); mask: (B, 1, Sq, Sk), nonzero = keep."""
    b, heads, sq, dk = q.shape
    sk = k.shape[2]
    if mask.dtype != jnp.int8:
        mask = (mask != 0).astype(jnp.int8)  # 1 byte/elem of mask DMA
    tq = _divisor_tile(sq, _TUNE["tq"], 8)
    tk = _divisor_tile(sk, _TUNE["tk"], 128)
    grid = (b, heads, sq // tq, sk // tk)
    return pl.pallas_call(
        functools.partial(_mha_kernel, scale=scale),
        out_shape=jax.ShapeDtypeStruct((b, heads, sq, dk), q.dtype),
        grid_spec=pltpu.PrefetchScalarGridSpec(
            num_scalar_prefetch=0, grid=grid,
            in_specs=[
                pl.BlockSpec((None, None, tq, dk), lambda bi, hi, qi, ki: (bi, hi, qi, 0)),
                pl.BlockSpec((None, None, tk, dk), lambda bi, hi, qi, ki: (bi, hi, ki, 0)),
                pl.BlockSpec((None, None, tk, dk), lambda bi, hi, qi, ki: (bi, hi, ki, 0)),
                pl.BlockSpec((None, None, tq, tk), lambda bi, hi, qi, ki: (bi, 0, qi, ki)),
            ],
            out_specs=pl.BlockSpec((None, None, tq, dk), lambda bi, hi, qi, ki: (bi, hi, qi, 0)),
            scratch_shapes=[pltpu.VMEM((tq, 1), jnp.float32),
                            pltpu.VMEM((tq, 1), jnp.float32),
                            pltpu.VMEM((tq, dk), jnp.float32)]),
        compiler_params=_compiler_params(("parallel", "parallel", "parallel", "arbitrary")),
    )(q, k, v, mask)
    # TODO(synk): process several heads per grid step on v6e/v7x to amortize per-step overhead.


# ------------- output projection over heads (head concat as a reduction) ----------

def _o_proj_kernel(a_ref, w_ref, b_ref, res_ref, o_ref, acc_ref):
    hi = pl.program_id(2)

    @pl.when(hi == 0)
    def _():
        acc_ref[...] = jnp.zeros_like(acc_ref)

    a = a_ref[...].astype(w_ref.dtype)
    acc_ref[...] += jnp.dot(a, w_ref[...], preferred_element_type=jnp.float32)

    @pl.when(hi == pl.num_programs(2) - 1)
    def _():
        # residual dropout (inference mode) == identity
        o_ref[...] = (acc_ref[...] + b_ref[...].astype(jnp.float32)
                      + res_ref[...].astype(jnp.float32)).astype(o_ref.dtype)


def o_projection(attn, wo_h, bo, residual):
    """attn: (B, H, S, dk); wo_h: (H, dk, d_model). out = concat_heads(attn) @ Wo + bo + residual."""
    b, heads, s, dk = attn.shape
    d = heads * dk
    ts = _token_tile(s, _TUNE["tm"])
    grid = (b, pl.cdiv(s, ts), heads)
    return pl.pallas_call(
        _o_proj_kernel,
        out_shape=jax.ShapeDtypeStruct((b, s, d), residual.dtype),
        grid_spec=pltpu.PrefetchScalarGridSpec(
            num_scalar_prefetch=0, grid=grid,
            in_specs=[
                pl.BlockSpec((None, None, ts, dk), lambda bi, si, hi: (bi, hi, si, 0)),
                pl.BlockSpec((None, dk, d), lambda bi, si, hi: (hi, 0, 0)),
                pl.BlockSpec((1, d), lambda bi, si, hi: (0, 0)),
                pl.BlockSpec((None, ts, d), lambda bi, si, hi: (bi, si, 0)),
            ],
            out_specs=pl.BlockSpec((None, ts, d), lambda bi, si, hi: (bi, si, 0)),
            scratch_shapes=[pltpu.VMEM((ts, d), jnp.float32)]),
        compiler_params=_compiler_params(("parallel", "parallel", "arbitrary")),
    )(attn, wo_h, bo, residual)


# ----------------------- fused LayerNorm + FFN + residual --------------------------

def _ln_ffn_kernel(x_ref, g_ref, bln_ref, w1_ref, b1_ref, w2_ref, b2_ref, o_ref,
                   xn_ref, acc_ref, *, eps):
    ki = pl.program_id(1)

    @pl.when(ki == 0)
    def _():
        x = x_ref[...].astype(jnp.float32)
        d = x.shape[-1]
        mean = jnp.mean(x, axis=-1, keepdims=True)
        diff = x - mean
        var = jnp.sum(diff * diff, axis=-1, keepdims=True) / (d - 1)
        xn = (g_ref[...].astype(jnp.float32) * diff / (jnp.sqrt(var) + eps)
              + bln_ref[...].astype(jnp.float32))
        xn_ref[...] = xn.astype(xn_ref.dtype)
        acc_ref[...] = jnp.zeros_like(acc_ref)

    h = jnp.dot(xn_ref[...], w1_ref[...], preferred_element_type=jnp.float32)
    h = jnp.maximum(h + b1_ref[...].astype(jnp.float32), 0.0)  # ReLU; dropout == identity (eval)
    acc_ref[...] += jnp.dot(h.astype(w2_ref.dtype), w2_ref[...],
                            preferred_element_type=jnp.float32)

    @pl.when(ki == pl.num_programs(1) - 1)
    def _():
        o_ref[...] = (acc_ref[...] + b2_ref[...].astype(jnp.float32)
                      + x_ref[...].astype(jnp.float32)).astype(o_ref.dtype)


def ln_ffn_residual(x3d, gamma, beta, ffn, *, eps=1e-6):
    """out = x + Linear2(ReLU(Linear1(LayerNorm(x)))), fused, tiled over tokens and d_ff."""
    b, s, d = x3d.shape
    m = b * s
    x2 = x3d.reshape(m, d)                      # free view
    d_ff = ffn["w1_t"].shape[1]
    tm = _token_tile(m, _TUNE["tm"])
    tf = _divisor_tile(d_ff, _TUNE["tf"], 128)
    grid = (pl.cdiv(m, tm), d_ff // tf)
    out = pl.pallas_call(
        functools.partial(_ln_ffn_kernel, eps=eps),
        out_shape=jax.ShapeDtypeStruct((m, d), x3d.dtype),
        grid_spec=pltpu.PrefetchScalarGridSpec(
            num_scalar_prefetch=0, grid=grid,
            in_specs=[
                pl.BlockSpec((tm, d), lambda i, k: (i, 0)),
                pl.BlockSpec((1, d), lambda i, k: (0, 0)),
                pl.BlockSpec((1, d), lambda i, k: (0, 0)),
                pl.BlockSpec((d, tf), lambda i, k: (0, k)),
                pl.BlockSpec((1, tf), lambda i, k: (0, k)),
                pl.BlockSpec((tf, d), lambda i, k: (k, 0)),
                pl.BlockSpec((1, d), lambda i, k: (0, 0)),
            ],
            out_specs=pl.BlockSpec((tm, d), lambda i, k: (i, 0)),
            scratch_shapes=[pltpu.VMEM((tm, d), ffn["w1_t"].dtype),
                            pltpu.VMEM((tm, d), jnp.float32)]),
        compiler_params=_compiler_params(("parallel", "arbitrary")),
    )(x2, gamma, beta, ffn["w1_t"], ffn["b1"], ffn["w2_t"], ffn["b2"])
    return out.reshape(b, s, d)


# --------------------------------- DecoderBlock ------------------------------------

def decoder_block(x, enc_out, src_mask, tgt_mask, params, *, h, eps=1e-6):
    d = x.shape[-1]
    dk = d // h
    scale = 1.0 / math.sqrt(dk)

    # residual 0: pre-norm self-attention (LN fused into QKV, residual fused into o-projection)
    sa = params["self_attn"]
    q, k, v = ln_multi_proj(x, params["ln0_a"], params["ln0_b"],
                            [sa["wq_h"], sa["wk_h"], sa["wv_h"]],
                            [sa["bq_h"], sa["bk_h"], sa["bv_h"]],
                            apply_ln=True, eps=eps)
    attn = mha_attention(q, k, v, tgt_mask, scale=scale)
    x = o_projection(attn, sa["wo_h"], sa["bo"], residual=x)

    # residual 1: pre-norm cross-attention (encoder output is NOT normalized, per the module)
    ca = params["cross_attn"]
    (q,) = ln_multi_proj(x, params["ln1_a"], params["ln1_b"],
                         [ca["wq_h"]], [ca["bq_h"]], apply_ln=True, eps=eps)
    k, v = ln_multi_proj(enc_out, None, None,
                         [ca["wk_h"], ca["wv_h"]], [ca["bk_h"], ca["bv_h"]],
                         apply_ln=False)
    attn = mha_attention(q, k, v, src_mask, scale=scale)
    x = o_projection(attn, ca["wo_h"], ca["bo"], residual=x)

    # residual 2: pre-norm feed-forward (LN + linear1 + relu + linear2 + residual, one kernel)
    return ln_ffn_residual(x, params["ln2_a"], params["ln2_b"], params["ffn"], eps=eps)


# ------------------ parameter setup (one-time layout conversion) -------------------

def prepare_params(raw, *, h, dtype=jnp.float32):
    """Convert PyTorch layout ((out, in) weights, 1-D biases) to kernel layout ONCE.
    Use dtype=jnp.bfloat16 for bf16 MXU operands (accumulation stays f32 in-kernel)."""
    def attn(p):
        d = p["wq"].shape[0]
        dk = d // h

        def w_heads(w):   # (out=d, in=d) -> (H, d_in, dk): per-head output columns
            return jnp.transpose(w.T.reshape(d, h, dk), (1, 0, 2)).astype(dtype)

        def b_heads(bv):
            return bv.reshape(h, 1, dk).astype(jnp.float32)

        return {
            "wq_h": w_heads(p["wq"]), "bq_h": b_heads(p["bq"]),
            "wk_h": w_heads(p["wk"]), "bk_h": b_heads(p["bk"]),
            "wv_h": w_heads(p["wv"]), "bv_h": b_heads(p["bv"]),
            # o-projection consumed as a reduction over heads: (H, dk, d_out)
            "wo_h": p["wo"].T.reshape(h, dk, d).astype(dtype),
            "bo": p["bo"].reshape(1, -1).astype(jnp.float32),
        }

    out = {
        "self_attn": attn(raw["self_attn"]),
        "cross_attn": attn(raw["cross_attn"]),
        "ffn": {
            "w1_t": raw["ffn"]["w1"].T.astype(dtype),
            "b1": raw["ffn"]["b1"].reshape(1, -1).astype(jnp.float32),
            "w2_t": raw["ffn"]["w2"].T.astype(dtype),
            "b2": raw["ffn"]["b2"].reshape(1, -1).astype(jnp.float32),
        },
    }
    for name in ("ln0", "ln1", "ln2"):
        out[name + "_a"] = raw[name + "_a"].reshape(1, -1).astype(jnp.float32)
        out[name + "_b"] = raw[name + "_b"].reshape(1, -1).astype(jnp.float32)
    return out


def init_raw_params(key, d_model, d_ff):
    keys = iter(jax.random.split(key, 32))

    def nrm(shape, scale=0.1):
        return jax.random.normal(next(keys), shape, dtype=jnp.float32) * scale

    def attn():
        return {
            "wq": nrm((d_model, d_model)), "bq": nrm((d_model,)),
            "wk": nrm((d_model, d_model)), "bk": nrm((d_model,)),
            "wv": nrm((d_model, d_model)), "bv": nrm((d_model,)),
            "wo": nrm((d_model, d_model)), "bo": nrm((d_model,)),
        }

    return {
        "ln0_a": 1.0 + nrm((d_model,)), "ln0_b": nrm((d_model,)),
        "ln1_a": 1.0 + nrm((d_model,)), "ln1_b": nrm((d_model,)),
        "ln2_a": 1.0 + nrm((d_model,)), "ln2_b": nrm((d_model,)),
        "self_attn": attn(),
        "cross_attn": attn(),
        "ffn": {
            "w1": nrm((d_ff, d_model)), "b1": nrm((d_ff,)),
            "w2": nrm((d_model, d_ff)), "b2": nrm((d_model,)),
        },
    }


# ------------------------------ pure-JAX reference ----------------------------------

def _ln_ref(x, a, b, eps=1e-6):
    mean = jnp.mean(x, axis=-1, keepdims=True)
    std = jnp.std(x, axis=-1, keepdims=True, ddof=1)
    return a * (x - mean) / (std + eps) + b


def _linear_ref(x, w, b):  # w: (out, in)
    return jnp.einsum("...i,oi->...o", x, w, precision=lax.Precision.HIGHEST) + b


def _mha_ref(q_in, k_in, v_in, mask, p, h):
    b, sq, d = q_in.shape
    sk = k_in.shape[1]
    dk = d // h
    q = _linear_ref(q_in, p["wq"], p["bq"]).reshape(b, sq, h, dk).transpose(0, 2, 1, 3)
    k = _linear_ref(k_in, p["wk"], p["bk"]).reshape(b, sk, h, dk).transpose(0, 2, 1, 3)
    v = _linear_ref(v_in, p["wv"], p["bv"]).reshape(b, sk, h, dk).transpose(0, 2, 1, 3)
    s = jnp.einsum("bhqd,bhkd->bhqk", q, k, precision=lax.Precision.HIGHEST) / math.sqrt(dk)
    s = jnp.where(mask == 0, -1e9, s)
    p_attn = jax.nn.softmax(s, axis=-1)
    o = jnp.einsum("bhqk,bhkd->bhqd", p_attn, v, precision=lax.Precision.HIGHEST)
    o = o.transpose(0, 2, 1, 3).reshape(b, sq, d)
    return _linear_ref(o, p["wo"], p["bo"])


def _ffn_ref(x, p):
    hid = jnp.maximum(_linear_ref(x, p["w1"], p["b1"]), 0.0)
    return _linear_ref(hid, p["w2"], p["b2"])


def _decoder_ref(x, enc, src_mask, tgt_mask, raw, h):
    xn = _ln_ref(x, raw["ln0_a"], raw["ln0_b"])
    x = x + _mha_ref(xn, xn, xn, tgt_mask, raw["self_attn"], h)
    xn = _ln_ref(x, raw["ln1_a"], raw["ln1_b"])
    x = x + _mha_ref(xn, enc, enc, src_mask, raw["cross_attn"], h)
    xn = _ln_ref(x, raw["ln2_a"], raw["ln2_b"])
    return x + _ffn_ref(xn, raw["ffn"])


# ----------------------------------------- main --------------------------------------

if __name__ == "__main__":
    batch, seq, d_model, d_ff, n_heads = 2, 8, 32, 64, 4

    key = jax.random.PRNGKey(0)
    kx, ke, kp = jax.random.split(key, 3)
    x = jax.random.normal(kx, (batch, seq, d_model), dtype=jnp.float32)
    enc_out = jax.random.normal(ke, (batch, seq, d_model), dtype=jnp.float32)

    # Masks (nonzero = keep, 0 -> score = -1e9); int8 keeps mask DMA at 1 byte/element.
    tgt_mask = jnp.tile(jnp.tril(jnp.ones((seq, seq), jnp.int8))[None, None], (batch, 1, 1, 1))
    src_mask = jnp.ones((batch, 1, seq, seq), jnp.int8)

    raw = init_raw_params(kp, d_model, d_ff)   # PyTorch layout
    ref = _decoder_ref(x, enc_out, src_mask, tgt_mask, raw, n_heads)

    # f32 path: tight check against the pure-JAX reference.
    params_f32 = prepare_params(raw, h=n_heads, dtype=jnp.float32)
    out = jax.block_until_ready(
        decoder_block(x, enc_out, src_mask, tgt_mask, params_f32, h=n_heads))
    assert out.shape == (batch, seq, d_model)
    err = float(jnp.max(jnp.abs(out - ref)))
    assert err < 1e-2, f"f32 mismatch vs reference, max err {err}"

    # bf16 path: bf16 MXU operands with f32 accumulation (looser check).
    params_bf16 = prepare_params(raw, h=n_heads, dtype=jnp.bfloat16)
    out_bf16 = jax.block_until_ready(
        decoder_block(x.astype(jnp.bfloat16), enc_out.astype(jnp.bfloat16),
                      src_mask, tgt_mask, params_bf16, h=n_heads))
    err16 = float(jnp.max(jnp.abs(out_bf16.astype(jnp.float32) - ref)))
    assert err16 < 0.25, f"bf16 mismatch vs reference, max err {err16}"

    print("KERNEL_OK")
</pallas_src>

<mosaic_0001>
module attributes {stable_mosaic.version = 11 : i64} {
  func.func @_proj_kernel_body(%arg0: i32, %arg1: i32, %arg2: i32, %arg3: memref<1x8x32xf32, #tpu.memory_space<vmem>>, %arg4: memref<1x32xf32, #tpu.memory_space<vmem>>, %arg5: memref<1x32xf32, #tpu.memory_space<vmem>>, %arg6: memref<1x32x8xf32, #tpu.memory_space<vmem>>, %arg7: memref<1x1x8xf32, #tpu.memory_space<vmem>>, %arg8: memref<1x32x8xf32, #tpu.memory_space<vmem>>, %arg9: memref<1x1x8xf32, #tpu.memory_space<vmem>>, %arg10: memref<1x32x8xf32, #tpu.memory_space<vmem>>, %arg11: memref<1x1x8xf32, #tpu.memory_space<vmem>>, %arg12: memref<1x1x8x8xf32, #tpu.memory_space<vmem>>, %arg13: memref<1x1x8x8xf32, #tpu.memory_space<vmem>>, %arg14: memref<1x1x8x8xf32, #tpu.memory_space<vmem>>, %arg15: memref<8x32xf32, #tpu.memory_space<vmem>>) attributes {dimension_semantics = [#tpu.dimension_semantics<parallel>, #tpu.dimension_semantics<parallel>, #tpu.dimension_semantics<arbitrary>], iteration_bounds = array<i64: 2, 1, 4>, scalar_prefetch = 0 : i64, scratch_operands = 1 : i64, tpu.core_type = #tpu.core_type<tc>, window_params = [{transform_indices = @transform_0, window_bounds = array<i64: 1, 8, 32>}, {pipeline_mode = #tpu.pipeline_mode<synchronous>, transform_indices = @transform_1, window_bounds = array<i64: 1, 32>}, {pipeline_mode = #tpu.pipeline_mode<synchronous>, transform_indices = @transform_2, window_bounds = array<i64: 1, 32>}, {transform_indices = @transform_3, window_bounds = array<i64: 1, 32, 8>}, {transform_indices = @transform_4, window_bounds = array<i64: 1, 1, 8>}, {transform_indices = @transform_5, window_bounds = array<i64: 1, 32, 8>}, {transform_indices = @transform_6, window_bounds = array<i64: 1, 1, 8>}, {transform_indices = @transform_7, window_bounds = array<i64: 1, 32, 8>}, {transform_indices = @transform_8, window_bounds = array<i64: 1, 1, 8>}, {transform_indices = @transform_9, window_bounds = array<i64: 1, 1, 8, 8>}, {transform_indices = @transform_10, window_bounds = array<i64: 1, 1, 8, 8>}, {transform_indices = @transform_11, window_bounds = array<i64: 1, 1, 8, 8>}]} {
    %c0_i32 = arith.constant 0 : i32
    %0 = arith.cmpi eq, %arg2, %c0_i32 : i32
    %1 = arith.extui %0 : i1 to i32
    %c0_i32_0 = arith.constant 0 : i32
    %2 = arith.cmpi ne, %1, %c0_i32_0 : i32
    scf.if %2 {
      %c0_34 = arith.constant 0 : index
      %c0_35 = arith.constant 0 : index
      %c0_36 = arith.constant 0 : index
      %34 = vector.load %arg3[%c0_34, %c0_35, %c0_36] : memref<1x8x32xf32, #tpu.memory_space<vmem>>, vector<1x8x32xf32>
      %35 = vector.shape_cast %34 : vector<1x8x32xf32> to vector<8x32xf32>
      %cst_37 = arith.constant dense<0.000000e+00> : vector<8xf32>
      %36 = vector.multi_reduction <add>, %35, %cst_37 [1] : vector<8x32xf32> to vector<8xf32>
      %37 = vector.shape_cast %36 : vector<8xf32> to vector<8x1xf32>
      %cst_38 = arith.constant 3.200000e+01 : f32
      %38 = vector.broadcast %cst_38 : f32 to vector<8x1xf32>
      %39 = arith.divf %37, %38 : vector<8x1xf32>
      %40 = vector.broadcast %39 : vector<8x1xf32> to vector<8x32xf32>
      %41 = arith.subf %35, %40 : vector<8x32xf32>
      %42 = arith.mulf %41, %41 : vector<8x32xf32>
      %cst_39 = arith.constant dense<0.000000e+00> : vector<8xf32>
      %43 = vector.multi_reduction <add>, %42, %cst_39 [1] : vector<8x32xf32> to vector<8xf32>
      %44 = vector.shape_cast %43 : vector<8xf32> to vector<8x1xf32>
      %cst_40 = arith.constant 3.100000e+01 : f32
      %45 = vector.broadcast %cst_40 : f32 to vector<8x1xf32>
      %46 = arith.divf %44, %45 : vector<8x1xf32>
      %c0_41 = arith.constant 0 : index
      %c0_42 = arith.constant 0 : index
      %47 = vector.load %arg4[%c0_41, %c0_42] : memref<1x32xf32, #tpu.memory_space<vmem>>, vector<1x32xf32>
      %48 = vector.broadcast %47 : vector<1x32xf32> to vector<8x32xf32>
      %49 = arith.mulf %48, %41 : vector<8x32xf32>
      %50 = math.sqrt %46 : vector<8x1xf32>
      %cst_43 = arith.constant 9.99999997E-7 : f32
      %51 = vector.broadcast %cst_43 : f32 to vector<8x1xf32>
      %52 = arith.addf %50, %51 : vector<8x1xf32>
      %53 = vector.broadcast %52 : vector<8x1xf32> to vector<8x32xf32>
      %54 = arith.divf %49, %53 : vector<8x32xf32>
      %c0_44 = arith.constant 0 : index
      %c0_45 = arith.constant 0 : index
      %55 = vector.load %arg5[%c0_44, %c0_45] : memref<1x32xf32, #tpu.memory_space<vmem>>, vector<1x32xf32>
      %56 = vector.broadcast %55 : vector<1x32xf32> to vector<8x32xf32>
      %57 = arith.addf %54, %56 : vector<8x32xf32>
      %c0_46 = arith.constant 0 : index
      %c0_47 = arith.constant 0 : index
      %58 = vector.load %arg15[%c0_46, %c0_47] : memref<8x32xf32, #tpu.memory_space<vmem>>, vector<8x32xf32>
      tpu.vector_store %arg15[%c0_46, %c0_47], %57 {strides = array<i32>} : memref<8x32xf32, #tpu.memory_space<vmem>>, vector<8x32xf32>,
    } else {
    }
    %c0 = arith.constant 0 : index
    %c0_1 = arith.constant 0 : index
    %3 = vector.load %arg15[%c0, %c0_1] : memref<8x32xf32, #tpu.memory_space<vmem>>, vector<8x32xf32>
    %c0_2 = arith.constant 0 : index
    %c0_3 = arith.constant 0 : index
    %c0_4 = arith.constant 0 : index
    %4 = vector.load %arg6[%c0_2, %c0_3, %c0_4] : memref<1x32x8xf32, #tpu.memory_space<vmem>>, vector<1x32x8xf32>
    %5 = vector.shape_cast %4 : vector<1x32x8xf32> to vector<32x8xf32>
    %cst = arith.constant dense<0.000000e+00> : vector<8x8xf32>
    %6 = tpu.matmul %3, %5, %cst {dimension_numbers = #tpu.dot_dimension_numbers<[1], [0], [0], [1], [0, 0, 1, 1], [], []>} : vector<8x32xf32>, vector<32x8xf32>, vector<8x8xf32> -> vector<8x8xf32>
    %c0_5 = arith.constant 0 : index
    %c0_6 = arith.constant 0 : index
    %c0_7 = arith.constant 0 : index
    %7 = vector.load %arg7[%c0_5, %c0_6, %c0_7] : memref<1x1x8xf32, #tpu.memory_space<vmem>>, vector<1x1x8xf32>
    %8 = vector.shape_cast %7 : vector<1x1x8xf32> to vector<1x8xf32>
    %9 = vector.broadcast %8 : vector<1x8xf32> to vector<8x8xf32>
    %10 = arith.addf %6, %9 : vector<8x8xf32>
    %c0_8 = arith.constant 0 : index
    %c0_9 = arith.constant 0 : index
    %c0_10 = arith.constant 0 : index
    %c0_11 = arith.constant 0 : index
    %11 = vector.load %arg12[%c0_8, %c0_9, %c0_10, %c0_11] : memref<1x1x8x8xf32, #tpu.memory_space<vmem>>, vector<1x1x8x8xf32>
    %12 = vector.shape_cast %11 : vector<1x1x8x8xf32> to vector<8x8xf32>
    %13 = vector.shape_cast %10 : vector<8x8xf32> to vector<1x1x8x8xf32>
    tpu.vector_store %arg12[%c0_8, %c0_9, %c0_10, %c0_11], %13 {strides = array<i32>} : memref<1x1x8x8xf32, #tpu.memory_space<vmem>>, vector<1x1x8x8xf32>,
    %c0_12 = arith.constant 0 : index
    %c0_13 = arith.constant 0 : index
    %c0_14 = arith.constant 0 : index
    %14 = vector.load %arg8[%c0_12, %c0_13, %c0_14] : memref<1x32x8xf32, #tpu.memory_space<vmem>>, vector<1x32x8xf32>
    %15 = vector.shape_cast %14 : vector<1x32x8xf32> to vector<32x8xf32>
    %cst_15 = arith.constant dense<0.000000e+00> : vector<8x8xf32>
    %16 = tpu.matmul %3, %15, %cst_15 {dimension_numbers = #tpu.dot_dimension_numbers<[1], [0], [0], [1], [0, 0, 1, 1], [], []>} : vector<8x32xf32>, vector<32x8xf32>, vector<8x8xf32> -> vector<8x8xf32>
    %c0_16 = arith.constant 0 : index
    %c0_17 = arith.constant 0 : index
    %c0_18 = arith.constant 0 : index
    %17 = vector.load %arg9[%c0_16, %c0_17, %c0_18] : memref<1x1x8xf32, #tpu.memory_space<vmem>>, vector<1x1x8xf32>
    %18 = vector.shape_cast %17 : vector<1x1x8xf32> to vector<1x8xf32>
    %19 = vector.broadcast %18 : vector<1x8xf32> to vector<8x8xf32>
    %20 = arith.addf %16, %19 : vector<8x8xf32>
    %c0_19 = arith.constant 0 : index
    %c0_20 = arith.constant 0 : index
    %c0_21 = arith.constant 0 : index
    %c0_22 = arith.constant 0 : index
    %21 = vector.load %arg13[%c0_19, %c0_20, %c0_21, %c0_22] : memref<1x1x8x8xf32, #tpu.memory_space<vmem>>, vector<1x1x8x8xf32>
    %22 = vector.shape_cast %21 : vector<1x1x8x8xf32> to vector<8x8xf32>
    %23 = vector.shape_cast %20 : vector<8x8xf32> to vector<1x1x8x8xf32>
    tpu.vector_store %arg13[%c0_19, %c0_20, %c0_21, %c0_22], %23 {strides = array<i32>} : memref<1x1x8x8xf32, #tpu.memory_space<vmem>>, vector<1x1x8x8xf32>,
    %c0_23 = arith.constant 0 : index
    %c0_24 = arith.constant 0 : index
    %c0_25 = arith.constant 0 : index
    %24 = vector.load %arg10[%c0_23, %c0_24, %c0_25] : memref<1x32x8xf32, #tpu.memory_space<vmem>>, vector<1x32x8xf32>
    %25 = vector.shape_cast %24 : vector<1x32x8xf32> to vector<32x8xf32>
    %cst_26 = arith.constant dense<0.000000e+00> : vector<8x8xf32>
    %26 = tpu.matmul %3, %25, %cst_26 {dimension_numbers = #tpu.dot_dimension_numbers<[1], [0], [0], [1], [0, 0, 1, 1], [], []>} : vector<8x32xf32>, vector<32x8xf32>, vector<8x8xf32> -> vector<8x8xf32>
    %c0_27 = arith.constant 0 : index
    %c0_28 = arith.constant 0 : index
    %c0_29 = arith.constant 0 : index
    %27 = vector.load %arg11[%c0_27, %c0_28, %c0_29] : memref<1x1x8xf32, #tpu.memory_space<vmem>>, vector<1x1x8xf32>
    %28 = vector.shape_cast %27 : vector<1x1x8xf32> to vector<1x8xf32>
    %29 = vector.broadcast %28 : vector<1x8xf32> to vector<8x8xf32>
    %30 = arith.addf %26, %29 : vector<8x8xf32>
    %c0_30 = arith.constant 0 : index
    %c0_31 = arith.constant 0 : index
    %c0_32 = arith.constant 0 : index
    %c0_33 = arith.constant 0 : index
    %31 = vector.load %arg14[%c0_30, %c0_31, %c0_32, %c0_33] : memref<1x1x8x8xf32, #tpu.memory_space<vmem>>, vector<1x1x8x8xf32>
    %32 = vector.shape_cast %31 : vector<1x1x8x8xf32> to vector<8x8xf32>
    %33 = vector.shape_cast %30 : vector<8x8xf32> to vector<1x1x8x8xf32>
    tpu.vector_store %arg14[%c0_30, %c0_31, %c0_32, %c0_33], %33 {strides = array<i32>} : memref<1x1x8x8xf32, #tpu.memory_space<vmem>>, vector<1x1x8x8xf32>,
    return
  }
  func.func @transform_0(%arg0: i32, %arg1: i32, %arg2: i32) -> (i32, i32, i32) {
    %c0_i32 = arith.constant 0 : i32
    %c0_i32_0 = arith.constant 0 : i32
    return %arg0, %arg1, %c0_i32 : i32, i32, i32
  }
  func.func @transform_1(%arg0: i32, %arg1: i32, %arg2: i32) -> (i32, i32) {
    %c0_i32 = arith.constant 0 : i32
    %c0_i32_0 = arith.constant 0 : i32
    %c0_i32_1 = arith.constant 0 : i32
    return %c0_i32, %c0_i32_0 : i32, i32
  }
  func.func @transform_2(%arg0: i32, %arg1: i32, %arg2: i32) -> (i32, i32) {
    %c0_i32 = arith.constant 0 : i32
    %c0_i32_0 = arith.constant 0 : i32
    %c0_i32_1 = arith.constant 0 : i32
    return %c0_i32, %c0_i32_0 : i32, i32
  }
  func.func @transform_3(%arg0: i32, %arg1: i32, %arg2: i32) -> (i32, i32, i32) {
    %c0_i32 = arith.constant 0 : i32
    %c0_i32_0 = arith.constant 0 : i32
    %c0_i32_1 = arith.constant 0 : i32
    return %arg2, %c0_i32, %c0_i32_0 : i32, i32, i32
  }
  func.func @transform_4(%arg0: i32, %arg1: i32, %arg2: i32) -> (i32, i32, i32) {
    %c0_i32 = arith.constant 0 : i32
    %c0_i32_0 = arith.constant 0 : i32
    %c0_i32_1 = arith.constant 0 : i32
    return %arg2, %c0_i32, %c0_i32_0 : i32, i32, i32
  }
  func.func @transform_5(%arg0: i32, %arg1: i32, %arg2: i32) -> (i32, i32, i32) {
    %c0_i32 = arith.constant 0 : i32
    %c0_i32_0 = arith.constant 0 : i32
    %c0_i32_1 = arith.constant 0 : i32
    return %arg2, %c0_i32, %c0_i32_0 : i32, i32, i32
  }
  func.func @transform_6(%arg0: i32, %arg1: i32, %arg2: i32) -> (i32, i32, i32) {
    %c0_i32 = arith.constant 0 : i32
    %c0_i32_0 = arith.constant 0 : i32
    %c0_i32_1 = arith.constant 0 : i32
    return %arg2, %c0_i32, %c0_i32_0 : i32, i32, i32
  }
  func.func @transform_7(%arg0: i32, %arg1: i32, %arg2: i32) -> (i32, i32, i32) {
    %c0_i32 = arith.constant 0 : i32
    %c0_i32_0 = arith.constant 0 : i32
    %c0_i32_1 = arith.constant 0 : i32
    return %arg2, %c0_i32, %c0_i32_0 : i32, i32, i32
  }
  func.func @transform_8(%arg0: i32, %arg1: i32, %arg2: i32) -> (i32, i32, i32) {
    %c0_i32 = arith.constant 0 : i32
    %c0_i32_0 = arith.constant 0 : i32
    %c0_i32_1 = arith.constant 0 : i32
    return %arg2, %c0_i32, %c0_i32_0 : i32, i32, i32
  }
  func.func @transform_9(%arg0: i32, %arg1: i32, %arg2: i32) -> (i32, i32, i32, i32) {
    %c0_i32 = arith.constant 0 : i32
    %c0_i32_0 = arith.constant 0 : i32
    return %arg0, %arg2, %arg1, %c0_i32 : i32, i32, i32, i32
  }
  func.func @transform_10(%arg0: i32, %arg1: i32, %arg2: i32) -> (i32, i32, i32, i32) {
    %c0_i32 = arith.constant 0 : i32
    %c0_i32_0 = arith.constant 0 : i32
    return %arg0, %arg2, %arg1, %c0_i32 : i32, i32, i32, i32
  }
  func.func @transform_11(%arg0: i32, %arg1: i32, %arg2: i32) -> (i32, i32, i32, i32) {
    %c0_i32 = arith.constant 0 : i32
    %c0_i32_0 = arith.constant 0 : i32
    return %arg0, %arg2, %arg1, %c0_i32 : i32, i32, i32, i32
  }
}

</mosaic_0001>

<bundles_post_ra>
// kernel: tpu_custom_call.1
= control target key start
LH: loop header
LB: loop body
LE: loop exit
PB: predicated region body
PF: predicated region fallthrough
CT: control target
= control target key end

     0   :  { %s1824_s0 = inlined_call_operand.vmem [shape: f32[2,8,32], index: 0, kind: input, shape index: {}]   ;;  %s1825_s1 = inlined_call_operand.vmem [shape: f32[1,32], index: 1, kind: input, shape index: {}]   ;;  %s1826_s2 = inlined_call_operand.vmem [shape: f32[1,32], index: 2, kind: input, shape index: {}]   ;;  %s1827_s3 = inlined_call_operand.vmem [shape: f32[4,32,8], index: 3, kind: input, shape index: {}]   ;;  %s1828_s4 = inlined_call_operand.vmem [shape: f32[4,1,8], index: 4, kind: input, shape index: {}]   ;;  %s1829_s5 = inlined_call_operand.vmem [shape: f32[4,32,8], index: 5, kind: input, shape index: {}]   ;;  %s1830_s6 = inlined_call_operand.vmem [shape: f32[4,1,8], index: 6, kind: input, shape index: {}]   ;;  %s1831_s7 = inlined_call_operand.vmem [shape: f32[4,32,8], index: 7, kind: input, shape index: {}]   ;;  %s1832_s8 = inlined_call_operand.vmem [shape: f32[4,1,8], index: 8, kind: input, shape index: {}]   ;;  %s1833_s9 = inlined_call_operand.hbm [shape: f32[2,4,8,8], index: 9, kind: output, shape index: {0}]   ;;  %s1834_s10 = inlined_call_operand.hbm [shape: f32[2,4,8,8], index: 10, kind: output, shape index: {1}]   ;;  %s1835_s11 = inlined_call_operand.hbm [shape: f32[2,4,8,8], index: 11, kind: output, shape index: {2}]  }
   0x1   :  { %1851 = sst [smem:[#allocation19_spill]] %s1824_s0 }
   0x2   :  { %1852 = sst [smem:[#allocation20_spill]] %s1827_s3 }
   0x3   :  { %1853 = sst [smem:[#allocation21_spill]] %s1833_s9 }
   0x4   :  { %1854 = sst [smem:[#allocation22_spill]] %s1834_s10 }
   0x5   :  { %1855 = sst [smem:[#allocation23_spill]] %s1835_s11 }
   0x6   :  { %17 = vsyncpa [#allocation4], 0 }
   0x7   :  { %19 = vsyncpa [#allocation4 + $0x1], 0 }
   0x8   :  { %20 = vsyncpa [#allocation6], 0 }
   0x9   :  { %22 = vsyncpa [#allocation6 + $0x1], 0  ;;  %s1523_s17 = smov 0   ;;  %s1525_s18 = smov 0  }
   0xa   :  { %s1527_s19 = smov 0   ;;  %s1529_s20 = smov 0  }
   0xb   :  { %s1531_s21 = smov 0   ;;  %s1533_s22 = smov 0  }
   0xc   :  { %s1535_s23 = smov 0   ;;  %s1537_s24 = smov 0  }
   0xd LB: > { %1856 = sst [smem:[#allocation10_spill]] %s1427_s17  ;;  %s1837_s25 = sadd.s32 4294967295, %s1455_s24   ;;  %s1455_s24 = sphi %s1537_s24, %s28_s24   ;;  %s1451_s23 = sphi %s1535_s23, %s1884_s23   ;;  %s1447_s22 = sphi %s1533_s22, %s1883_s22   ;;  %s1443_s21 = sphi %s1531_s21, %s1882_s21   ;;  %s1439_s20 = sphi %s1529_s20, %s1881_s20   ;;  %s1435_s19 = sphi %s1527_s19, %s1880_s19   ;;  %s1431_s18 = sphi %s1525_s18, %s1886_s18   ;;  %s1427_s17 = sphi %s1523_s17, %s1885_s17  }
   0xe   : > { %1857 = sst [smem:[#allocation11_spill]] %s1435_s19  ;;  %s1836_s26 = sadd.s32 4294967294, %s1455_s24  }
   0xf   : > { %1858 = sst [smem:[#allocation12_spill]] %s1447_s22  ;;  %s40_s27 = sadd.s32 1, %s1447_s22 }
  0x10   : > { %1859 = sst [smem:[#allocation13_spill]] %s1451_s23  ;;  %p41_p0 = scmp.ge.s32.totalorder %s40_s27, 4 }
  0x11   : > { %s47_s28 = sadd.s32 1, %s1451_s23  ;;  %p294_p1 = scmp.ne.s32.totalorder %s1435_s19, %s1431_s18 }
  0x12   : > { %p295_p2 = scmp.eq.s32.totalorder %s1837_s25, 7  ;;  %s1888_s27 = smov (%p41_p0, %s40_s27), 0 }
  0x13   : > { %1860 = sst [smem:[#allocation14_spill]] %s1888_s27  ;;  %s1890_s28 = smov (!%p41_p0, %s47_s28), %s1451_s23 }
  0x14   : > { %s278_s29 = ssub.s32 %s1447_s22, %s1888_s27  ;;  %p1576_p3 = por %p295_p2, %p294_p1 }
  0x15   : > { %p49_p4 = scmp.ge.s32.totalorder %s1890_s28, 2  ;;  %p300_p5 = scmp.ne.s32.totalorder %s1431_s18, %s1427_s17 }
  0x16   : > { %s1861_s30 = scalar_select %p1576_p3, 1, 0 }
  0x17   : > { %p301_p6 = scmp.eq.s32.totalorder %s1836_s26, 7  ;;  %p1113_p7 = scmp.ge.s32.totalorder %s1455_s24, 1 }
  0x18   : > { %1862 = sst [smem:[#allocation15_spill]] %s1861_s30  ;;  %s1892_s28 = smov (%p49_p4, %s1890_s28), 0 }
  0x19   : > { %1863 = sst [smem:[#allocation16_spill]] %s1892_s28  ;;  %p1587_p8 = por %p301_p6, %p300_p5 }
  0x1a   : > { %p437_p9 = scmp.lt.s32.totalorder %s1455_s24, 9  ;;  %s277_s13 = ssub.s32 %s1451_s23, %s1892_s28 }
  0x1b   : > { %s1864_s12 = scalar_select %p1587_p8, 1, 0 }
  0x1c   : > { %s284_s14 = sadd.s32 1, %s1435_s19  ;;  %s279_s15 = sor.u32 %s278_s29, %s277_s13 }
  0x1d   : > { %1865 = sst [smem:[#allocation17_spill]] %s1864_s12  ;;  %p438_p10 = pnand %p1113_p7, %p437_p9 }
  0x1e   : > { %p282_p11 = scmp.eq.s32.totalorder %s279_s15, 0  ;;  %s1842_s26 = sand.u32 (!%p438_p10), 1, %s1431_s18  }
  0x1f   : > { %441 = sbr.rel (%p438_p10) target bundleno = 656 (0x290), region = 56  ;;  %p513_p12 = scmp.lt.s32.totalorder (!%p438_p10), %s1443_s21, 1 }
  0x20   : > { %s1596_s16 = scalar_select %p282_p11, %s1435_s19, %s284_s14  }
  0x21   : > { %s1602_s25 = sshll.u32 (!%p438_p10), %s1842_s26, 3  ;;  %p520_p13 = scmp.lt.s32.totalorder (!%p438_p10), %s1439_s20, 3 }
  0x22   : > { %1866 = sst [smem:[#allocation18_spill]] %s1596_s16  ;;  %s1867_s0 = sld [smem:[#allocation19_spill]] (!%p438_p10) }
  0x23   : > { %s1868_s3 = sld [smem:[#allocation20_spill]] (!%p438_p10)  ;;  %s498_s19 = scalar_lea.vmem (!%p438_p10), [#allocation3], %s1602_s25 }
  0x24   : > { %s505_s12 = scalar_lea.vmem (!%p438_p10), [#allocation5], %s1602_s25  ;;  %s512_s17 = scalar_lea.vmem (!%p438_p10), [#allocation7], %s1602_s25 }
  0x25   : > { %p1124_p0 = scmp.ne.s32.totalorder (!%p438_p10), %s1439_s20, 0 }
  0x26   : > { %s514_s29 = scalar_select %p513_p12, %s1443_s21, 1 }
  0x27   : > { %s1607_s13 = scalar_select %p520_p13, %s1439_s20, 3 }
  0x28   : > { %s1117_s14 = sshll.u32 %s514_s29, 3  ;;  %547 = sbr.rel (%p1124_p0) target bundleno = 370 (0x172), region = 60  ;;  %vm549_vm0 = vcmask (!%p1124_p0), 261120   ;;  %v1125_v15 = vld [vmem:[%s1825_s1] ss:$0 sm:$0xff] (!%p1124_p0) }
  0x29   : > { %s519_s27 = scalar_lea.vmem %s1867_s0, %s1117_s14  ;;  %s1144_s23 = sshll.u32 %s1607_s13, 5  ;;  %v1126_v18 = vld [vmem:[%s1826_s2] ss:$0 sm:$0xff] (!%p1124_p0) }
  0x2a   : > { %s1616_s16 = scalar_lea.vmem %s1868_s3, %s1144_s23  ;;  %s1625_s9 = scalar_lea.vmem %s1829_s5, %s1144_s23  ;;  %v548_v0 = vld [vmem:[%s519_s27] sm:$0xff] (!%p1124_p0) }
  0x2b   : > { %s535_s28 = scalar_lea.vmem %s1830_s6, %s1607_s13  ;;  %s1634_s0 = scalar_lea.vmem %s1831_s7, %s1144_s23  ;;  %v550_v1 = vsel (!%p1124_p0), %vm549_vm0, %v548_v0, 0.0 }
  0x2c   : > { %s543_s3 = scalar_lea.vmem %s1832_s8, %s1607_s13  ;;  %551 = vadd.xlane.f32.xlu0 (!%p1124_p0), %v550_v1 }
  0xb9   : > { %v552_v2 = vpop.xlane.xlu0 %551 }
  0xba   : > { %v554_v3 = vmul.f32 0.03125, %v552_v2 }
  0xbc   : > { %v555_v4 = vsub.f32 %v548_v0, %v554_v3 }
  0xbe   : > { %v556_v5 = vmul.f32 %v555_v4, %v555_v4  ;;  %v569_v16 = vmul.f32 %v1125_v15, %v555_v4 }
  0xc0   : > { %v557_v6 = vsel %vm549_vm0, %v556_v5, 0.0 }
  0xc1   : > { %558 = vadd.xlane.f32.xlu0 %v557_v6 }
 0x14e   : > { %v559_v7 = vpop.xlane.xlu0 %558 }
 0x14f   : > { %v561_v8 = vmul.f32 0.032258064, %v559_v7 }
 0x151   : > { %1297 = vrsqrt.f32 %v561_v8  ;;  %vm572_vm1 = vcmp.eq.f32.partialorder %v561_v8, inf  ;;  %v575_v11 = vand.u32 2147483648, %v561_v8  ;;  %vm574_vm2 = vcmp.eq.f32.partialorder %v561_v8, 0.0 }
 0x15b   : > { %v1298_v9 = vpop.eup %1297 }
 0x15c   : > { %v571_v10 = vmul.f32 %v1298_v9, %v561_v8 }
 0x15e   : > { %v573_v12 = vsel %vm572_vm1, %v561_v8, %v571_v10 }
 0x15f   : > { %v576_v13 = vsel %vm574_vm2, %v575_v11, %v573_v12 }
 0x160   : > { %v577_v14 = vadd.f32 1e-06, %v576_v13 }
 0x162   : > { %1299 = vrcp.f32 %v577_v14 }
 0x16c   : > { %v1300_v17 = vpop.eup %1299 }
 0x16d   : > { %v579_v19 = vmul.f32 %v1300_v17, %v569_v16 }
 0x16f   : > { %v587_v20 = vadd.f32 %v1126_v18, %v579_v19 }
 0x171   : > { %588 = vst.msk [vmem:[#allocation2] sm:$0xff] %vm549_vm0, %v587_v20 }
 0x172 PF: > { %v590_v21 = vld [vmem:[%s1616_s16] sm:$0xff]  ;;  %v591_v22 = vld [vmem:[%s1616_s16 + $0x8] sm:$0xff]  ;;  %v592_v23 = vld [vmem:[%s1616_s16 + $0x10] sm:$0xff]  ;;  %v1457_v24 = vmov 0.0|0.0   ;;  %vm1458_vm3 = vmmov 0   ;;  %v1459_v29 = vmov 0.0   ;;  %s1870_s22 = scalar_lea.vmem %s1828_s4, %s1607_s13 }
 0x173   : > { %1195 = vmatprep.subr.bf16.mxu0 %v1457_v24  ;;  %v1196_v25 = vpack.c.bf16 %v591_v22, %v590_v21  ;;  %v593_v26 = vld [vmem:[%s1616_s16 + $0x18] sm:$0xff]  ;;  %1201 = vmatprep.subr.bf16.mxu1 %v1457_v24  ;;  %v677_v27 = vld [vmem:[%s1625_s9] sm:$0xff]  ;;  %v678_v28 = vld [vmem:[%s1625_s9 + $0x8] sm:$0xff]  ;;  %vm601_vm4 = vcmask 261120   ;;  %s1869_s16 = sadd.s32 4294967295, %s1455_s24   ;;  %s868_s26 = sshll.u32 %s498_s19, 4  ;;  %s1696_s26 = int_to_ptr.vmem [resolvable:$true] %s868_s26 }
 0x174   : > { %1170 = vmatprep.mubr.msk.f32.mxu0 %vm1458_vm3, %v1459_v29  ;;  %v1202_v30 = vpack.c.bf16 %v678_v28, %v677_v27  ;;  %1181 = vmatprep.mubr.msk.f32.mxu1 %vm1458_vm3, %v1459_v29  ;;  %v1199_v31 = vpack.c.bf16 %v593_v26, %v592_v23  ;;  %v679_v32 = vld [vmem:[%s1625_s9 + $0x10] sm:$0xff]  ;;  %v680_v33 = vld [vmem:[%s1625_s9 + $0x18] sm:$0xff]  ;;  %v759_v34 = vld [vmem:[%s1634_s0] sm:$0xff]  ;;  %s1136_s9 = sshll.u32 %s1443_s21, 2  ;;  %s1672_s29 = sand.u32 1, %s1869_s16   ;;  %vm675_vm5 = vcmask 64512  }
 0x175   : > { %1197 = vmatpush3.bf16.msra.mxu0 %v1196_v25  ;;  %v760_v35 = vld [vmem:[%s1634_s0 + $0x8] sm:$0xff]  ;;  %v1205_v36 = vpack.c.bf16 %v680_v33, %v679_v32  ;;  %v761_v39 = vld [vmem:[%s1634_s0 + $0x10] sm:$0xff]  ;;  %v762_v40 = vld [vmem:[%s1634_s0 + $0x18] sm:$0xff]  ;;  %s864_s30 = sadd.s32 %s1439_s20, %s1136_s9  ;;  %s884_s20 = sshll.u32 %s505_s12, 4  ;;  %s1704_s20 = int_to_ptr.vmem [resolvable:$true] %s884_s20 }
 0x176   : > { %1198 = vmatprep.subr.bf16.mxu0 %v1457_v24  ;;  %1203 = vmatpush3.bf16.msra.mxu1 %v1202_v30  ;;  %v1208_v38 = vpack.c.bf16 %v760_v35, %v759_v34  ;;  %v1211_v41 = vpack.c.bf16 %v762_v40, %v761_v39  ;;  %v1127_v42 = vld [vmem:[%s1870_s22] ss:$0 sm:$0xff]  ;;  %s1679_s0 = sshll.u32 %s864_s30, 7  ;;  %s1872_s9 = sld [smem:[#allocation21_spill]] }
 0x177   : > { %1204 = vmatprep.subr.bf16.mxu1 %v1457_v24  ;;  %v1129_v43 = vld [vmem:[%s535_s28] ss:$0 sm:$0xff]  ;;  %s1873_s14 = sld [smem:[#allocation22_spill]]  ;;  %s1874_s22 = sand.u32 1, %s1431_s18  }
 0x178   : > { %v589_v37 = vld [vmem:[#allocation2] sm:$0xff]  ;;  %s842_s10 = scalar_lea.sflag [#allocation4], %s1874_s22  ;;  %s1301_s11 = scalar_lea.vmem %s1696_s26, 128 }
 0x179   : > { %1200 = vmatpush3.bf16.msra.mxu0 %v1199_v31  ;;  %p1302_p1 = scmp.ne.s32.totalorder %s1696_s26, %s1301_s11  ;;  %s1460_s23 = smov [#allocation3]  }
 0x17a   : > { %1207 = vmatprep.subr.bf16.mxu0 %v1457_v24  ;;  %1206 = vmatpush3.bf16.msra.mxu1 %v1205_v36  ;;  %s1305_s27 = sshll.u32 %s1460_s23, 4  ;;  %s1306_s27 = int_to_ptr.vmem [resolvable:$false] %s1305_s27 }
 0x17b   : > { %p1303_p2 = pnand %p1302_p1, %p1576_p3  ;;  %s1307_s28 = scalar_lea.vmem %s1306_s27, 256 }
 0x17c   : > { %1171 = vmatmul.mubr.msk.f32.vlgmr.msra.gmra.mrb[0].mxu0 %vm601_vm4, %v589_v37  ;;  %s1694_s30 = scalar_lea.hbm %s1872_s9, %s1679_s0  ;;  %p1308_p5 = scmp.lt.s32.totalorder %s1696_s26, %s1306_s27 }
 0x17d   : > { %1209 = vmatpush3.bf16.msra.mxu0 %v1208_v38  ;;  %1182 = vmatmul.mubr.msk.f32.vlgmr.msra.gmra.mrb[0].mxu1 %vm601_vm4, %v589_v37  ;;  %s1702_s15 = scalar_lea.hbm %s1873_s14, %s1679_s0  ;;  %p1304_p4 = pneg %p1303_p2 }
 0x17e   : > { %1210 = vmatprep.subr.bf16.mxu0 %v1457_v24  ;;  %1192 = vmatprep.mubr.msk.f32.mxu0 %vm1458_vm3, %v1459_v29  ;;  %p1309_p6 = scmp.lt.s32.totalorder %s1307_s28, %s1301_s11 }
 0x180   : > { %p1310_p7 = por %p1309_p6, %p1308_p5 }
 0x181   : > { %1212 = vmatpush3.bf16.msra.mxu0 %v1211_v41 }
 0x182   : > { %p1311_p9 = pnand %p1310_p7, %p1304_p4 }
 0x184   : > { %1193 = vmatmul.mubr.msk.f32.vlgmr.msra.gmra.mrb[2].mxu0 %vm601_vm4, %v589_v37 }
 0x24f   : > { %v671_v44 = vpop.f32.mrb[0].mxu0 }
 0x250   : > { %v672_v45 = vadd.f32 %v1127_v42, %v671_v44  ;;  %v1172_v46 = vpop.f32.mrb[1].mxu0  ;;  %v754_v47 = vpop.f32.mrb[0].mxu1 }
 0x251   : > { %v755_v48 = vadd.f32 %v1129_v43, %v754_v47  ;;  %v1183_v49 = vpop.f32.mrb[1].mxu1 }
 0x252   : > { %676 = vst.msk [vmem:[%s498_s19] sm:$0xff] %vm675_vm5, %v672_v45 }
 0x253   : > { %758 = vst.msk [vmem:[%s505_s12] sm:$0xff] %vm675_vm5, %v755_v48 }
 0x254   : > { %1314 = shalt.err (!%p1311_p9)
}
 0x255   : > { %s1315_s19 = scalar_lea.hbm %s1694_s30, 128  ;;  %s1319_s22 = scalar_lea.hbm %s1872_s9, 1024 }
 0x256   : > { %p1316_p10 = scmp.ne.s32.totalorder %s1694_s30, %s1315_s19  ;;  %p1320_p13 = scmp.lt.u32.totalorder %s1694_s30, %s1872_s9 }
 0x257   : > { %p1321_p0 = scmp.lt.u32.totalorder %s1319_s22, %s1315_s19  ;;  %p1323_p2 = scmp.lt.u32.totalorder %s1315_s19, %s1694_s30 }
 0x258   : > { %p1317_p11 = pnand %p1316_p10, %p1576_p3 }
 0x259   : > { %p1322_p1 = por %p1321_p0, %p1320_p13 }
 0x25a   : > { %p1318_p12 = pneg %p1317_p11 }
 0x25b   : > { %p1324_p4 = por %p1323_p2, %p1322_p1 }
 0x25d   : > { %p1325_p5 = pnand %p1324_p4, %p1318_p12 }
 0x25f   : > { %1328 = shalt.err (!%p1325_p5)
}
 0x260   : > { %1213 = dma.vmem_to_hbm [thread:$0]  (%p1576_p3), %s1696_s26, 128, %s1694_s30, %s842_s10  }
 0x261   : > { %s847_s11 = scalar_lea.sflag [#allocation6], %s1672_s29  ;;  %s1329_s28 = scalar_lea.vmem %s1704_s20, 128 }
 0x262   : > { %p1330_p6 = scmp.ne.s32.totalorder %s1704_s20, %s1329_s28  ;;  %s1461_s19 = smov [#allocation5]  }
 0x263   : > { %s1333_s12 = sshll.u32 %s1461_s19, 4  ;;  %s1334_s12 = int_to_ptr.vmem [resolvable:$false] %s1333_s12 }
 0x264   : > { %p1331_p7 = pnand %p1330_p6, %p1576_p3  ;;  %s1335_s16 = scalar_lea.vmem %s1334_s12, 256 }
 0x265   : > { %p1336_p10 = scmp.lt.s32.totalorder %s1704_s20, %s1334_s12  ;;  %p1337_p11 = scmp.lt.s32.totalorder %s1335_s16, %s1329_s28 }
 0x266   : > { %p1332_p9 = pneg %p1331_p7 }
 0x267   : > { %p1338_p12 = por %p1337_p11, %p1336_p10 }
 0x269   : > { %p1339_p13 = pnand %p1338_p12, %p1332_p9 }
 0x26b   : > { %1342 = shalt.err (!%p1339_p13)
}
 0x26c   : > { %s1343_s26 = scalar_lea.hbm %s1702_s15, 128  ;;  %s1347_s22 = scalar_lea.hbm %s1873_s14, 1024 }
 0x26d   : > { %p1344_p0 = scmp.ne.s32.totalorder %s1702_s15, %s1343_s26  ;;  %p1348_p4 = scmp.lt.u32.totalorder %s1702_s15, %s1873_s14 }
 0x26e   : > { %p1349_p5 = scmp.lt.u32.totalorder %s1347_s22, %s1343_s26  ;;  %p1351_p7 = scmp.lt.u32.totalorder %s1343_s26, %s1702_s15 }
 0x26f   : > { %p1345_p1 = pnand %p1344_p0, %p1576_p3 }
 0x270   : > { %p1350_p6 = por %p1349_p5, %p1348_p4 }
 0x271   : > { %p1346_p2 = pneg %p1345_p1 }
 0x272   : > { %p1352_p9 = por %p1351_p7, %p1350_p6 }
 0x274   : > { %p1353_p10 = pnand %p1352_p9, %p1346_p2 }
 0x276   : > { %1356 = shalt.err (!%p1353_p10)
}
 0x277   : > { %1214 = dma.vmem_to_hbm [thread:$0]  (%p1576_p3), %s1704_s20, 128, %s1702_s15, %s847_s11   ;;  %v1131_v50 = vld [vmem:[%s543_s3] ss:$0 sm:$0xff]  ;;  %v836_v51 = vpop.f32.mrb[2].mxu0 }
 0x278   : > { %s900_s12 = sshll.u32 %s512_s17, 4  ;;  %v837_v52 = vadd.f32 %v1131_v50, %v836_v51  ;;  %v1194_v53 = vpop.f32.mrb[3].mxu0  ;;  %s1875_s30 = sld [smem:[#allocation23_spill]]  ;;  %s901_s12 = int_to_ptr.vmem [resolvable:$true] %s900_s12 }
 0x279   : > { %s1357_s20 = scalar_lea.vmem %s901_s12, 128  ;;  %s1462_s3 = smov [#allocation7]  }
 0x27a   : > { %840 = vst.msk [vmem:[%s512_s17] sm:$0xff] %vm675_vm5, %v837_v52  ;;  %p1358_p11 = scmp.ne.s32.totalorder %s901_s12, %s1357_s20  ;;  %s1361_s13 = sshll.u32 %s1462_s3, 4  ;;  %s1362_s13 = int_to_ptr.vmem [resolvable:$false] %s1361_s13 }
 0x27b   : > { %s1363_s15 = scalar_lea.vmem %s1362_s13, 256  ;;  %p1364_p0 = scmp.lt.s32.totalorder %s901_s12, %s1362_s13 }
 0x27c   : > { %p1359_p12 = pnand %p1358_p11, %p1576_p3  ;;  %p1365_p1 = scmp.lt.s32.totalorder %s1363_s15, %s1357_s20 }
 0x27e   : > { %s1770_s10 = scalar_lea.hbm %s1875_s30, %s1679_s0  ;;  %p1360_p13 = pneg %p1359_p12 }
 0x27f   : > { %p1366_p2 = por %p1365_p1, %p1364_p0 }
 0x281   : > { %p1367_p4 = pnand %p1366_p2, %p1360_p13 }
 0x283   : > { %1370 = shalt.err (!%p1367_p4)
}
 0x284   : > { %s1371_s17 = scalar_lea.hbm %s1770_s10, 128  ;;  %s1375_s22 = scalar_lea.hbm %s1875_s30, 1024 }
 0x285   : > { %p1372_p5 = scmp.ne.s32.totalorder %s1770_s10, %s1371_s17  ;;  %p1376_p9 = scmp.lt.u32.totalorder %s1770_s10, %s1875_s30 }
 0x286   : > { %p1377_p10 = scmp.lt.u32.totalorder %s1375_s22, %s1371_s17  ;;  %p1379_p12 = scmp.lt.u32.totalorder %s1371_s17, %s1770_s10 }
 0x287   : > { %p1373_p6 = pnand %p1372_p5, %p1576_p3 }
 0x288   : > { %p1378_p11 = por %p1377_p10, %p1376_p9 }
 0x289   : > { %p1374_p7 = pneg %p1373_p6 }
 0x28a   : > { %p1380_p13 = por %p1379_p12, %p1378_p11 }
 0x28c   : > { %p1381_p0 = pnand %p1380_p13, %p1374_p7 }
 0x28e   : > { %1384 = shalt.err (!%p1381_p0)
}
 0x28f   : > { %1215 = dma.vmem_to_hbm [thread:$0]  (%p1576_p3), %s901_s12, 128, %s1770_s10, %s847_s11  }
 0x290 PF: > { %s1876_s28 = sld [smem:[#allocation10_spill]]  ;;  %p1229_p1 = scmp.ge.s32.totalorder %s1455_s24, 2 }
 0x292   : > { %p1220_p2 = pnand %p1229_p1, %p1587_p8 }
 0x296   : > { %s912_s16 = sand.u32 1, %s1876_s28  }
 0x297   : > { %s913_s26 = scalar_lea.sflag [#allocation4], %s912_s16 }
 0x298   : > { %1418 = dma.done.wait (!%p1220_p2), %s913_s26, 128  }
 0x299   : > { %1420 = vsyncadd (!%p1220_p2), %s913_s26, 4294967168  ;;  %s1878_s20 = sadd.s32 4294967294, %s1455_s24  }
 0x29a   : > { %s921_s3 = sand.u32 1, %s1878_s20  }
 0x29b   : > { %s922_s13 = scalar_lea.sflag [#allocation6], %s921_s3 }
 0x29c   : > { %1422 = dma.done.wait (!%p1220_p2), %s922_s13, 256  }
 0x29d   : > { %1424 = vsyncadd (!%p1220_p2), %s922_s13, 4294967040  ;;  %s28_s24 = sadd.s32 1, %s1455_s24   ;;  %s1879_s29 = sld [smem:[#allocation11_spill]] }
 0x29e   : > { %p25_p3 = scmp.ge.s32.totalorder %s28_s24, 10   ;;  %s1880_s19 = sld [smem:[#allocation18_spill]] }
 0x29f   : > { %s1881_s20 = sld [smem:[#allocation12_spill]]  ;;  %s1882_s21 = sld [smem:[#allocation13_spill]] }
 0x2a0   : > { %s1883_s22 = sld [smem:[#allocation14_spill]]  ;;  %s1884_s23 = sld [smem:[#allocation16_spill]] }
 0x2a1   : > { %s1885_s17 = smov %s1431_s18  ;;  %27 = sbr.rel (!%p25_p3) target bundleno = 13 (0xd), region = 145 }
 0x2a3   : > { %s1886_s18 = smov %s1879_s29 }
 0x2a8   :  { %936 = vsyncpa [#allocation4], 1 }
 0x2a9   :  { %938 = vsyncpa [#allocation4 + $0x1], 1 }
 0x2aa   :  { %939 = vsyncpa [#allocation6], 1 }
 0x2ab   :  { %941 = vsyncpa [#allocation6 + $0x1], 1 }

</bundles_post_ra>
